<compile_context>
chip_gen: v6e
topology: v6e:2x2x1
jax: 0.10.0
libtpu: 0.0.40
codegen_flags: <defaults>
</compile_context>

<pallas_src>
import functools

import jax
import jax.numpy as jnp
from jax import lax
from jax.experimental import pallas as pl
from jax.experimental.pallas import tpu as pltpu


def _expand_ln_kernel(x_ref, w_ref, pool_ref, bg_ref, beta_ref, o_ref, *, p, eps):
    """One (batch, H-tile) step: centered expand + grouped LayerNorm.

    x_ref:    (1, TH, W, dim)       input tokens for TH spatial rows
    w_ref:    (dim, p*p*dim)        mean-centered expand weight (LN mean folded in)
    pool_ref: (p*p*dim, p*p)        group-mean matrix (1/dim inside each (p1,p2) group)
    bg_ref:   (p*p, p*p*dim)        group broadcast-back matrix with gamma folded in
    beta_ref: (1, p*p*dim)          LN beta tiled across the p*p groups
    o_ref:    (1, TH, p, W, p*dim)  output slab, memory-identical to NHWC
    """
    blk = x_ref[...]
    _, th, wsp, d_in = blk.shape
    x2d = blk.reshape(th * wsp, d_in)                      # (R, dim), rows (h, w)

    # Expand with LayerNorm's mean already folded into the weight columns:
    # d = y - mean_c(y) exactly, in a single MXU matmul.
    d = jnp.dot(x2d, w_ref[...], preferred_element_type=jnp.float32)        # (R, 16*dim)

    # Per-(p1,p2) group variance via one MXU pooling matmul; rsqrt stays on the
    # tiny (R, p*p) tensor so the single EUP is never on the critical path.
    var = jnp.dot(d * d, pool_ref[...], preferred_element_type=jnp.float32)  # (R, p*p)
    inv = lax.rsqrt(var + eps)                                               # (R, p*p)

    # Broadcast-back with gamma folded in: scale[r,(g,c)] = inv[r,g]*gamma[c].
    scale = jnp.dot(inv, bg_ref[...], preferred_element_type=jnp.float32)    # (R, 16*dim)
    out = (d * scale + beta_ref[...]).astype(o_ref.dtype)

    # Four lane-aligned slab stores (one per p1).  Each slab's row-major order
    # (h, w, p2, c) is exactly the memory order of o_ref[0, :, p1, :, :], so the
    # pixel shuffle is free: no extra HBM pass for the 16x-expanded tensor.
    slab_cols = out.shape[1] // p
    for p1 in range(p):
        slab = out[:, p1 * slab_cols:(p1 + 1) * slab_cols]                   # static, 128-aligned
        o_ref[0, :, p1, :, :] = slab.reshape(th, wsp, slab_cols)


def _vmem_capacity_bytes():
    """Per-core VMEM capacity; falls back to the v7x floor (64 MiB)."""
    try:
        info = pltpu.get_tpu_info()
        cap = int(getattr(info, "vmem_capacity_bytes", 0))
        if cap > 0:
            return cap
    except Exception:
        pass
    return 64 * 1024 * 1024


def swin_expand_x4(x, w_expand, ln_gamma, ln_beta, *, dim_scale=4, eps=1e-5,
                   tile_h=None, nchw_output=True):
    """x: (B, dim, H, W) NCHW. Returns (B, dim, 4H, 4W) NCHW (or NHWC if asked)."""
    B, dim, H, W = x.shape
    p = dim_scale
    cols = p * p * dim
    assert w_expand.shape == (cols, dim), w_expand.shape

    # NCHW -> NHWC once on the input (1/16 of the output size, cheap).
    x_nhwc = jnp.transpose(x, (0, 2, 3, 1))                       # (B, H, W, dim)

    # PyTorch Linear weight is (out, in); kernel wants (in, out) with output
    # columns ordered (p1, p2, c).  Fold LayerNorm's mean removal into the
    # weight: x @ (W - group_mean_c(W)) == (x @ W) - group_mean_c(x @ W).
    w_t = jnp.transpose(w_expand).astype(jnp.float32)             # (dim, cols)
    w_g = w_t.reshape(dim, p * p, dim)
    w_c = (w_g - jnp.mean(w_g, axis=-1, keepdims=True)).reshape(dim, cols)

    # Constant LN matrices (tiny; fetched once, resident across the grid).
    grp = (jnp.arange(cols) // dim)[:, None] == jnp.arange(p * p)[None, :]
    pool = grp.astype(jnp.float32) / dim                          # (cols, p*p)
    gamma_t = jnp.tile(ln_gamma.astype(jnp.float32), p * p)       # (cols,)
    bcast_gamma = grp.T.astype(jnp.float32) * gamma_t[None, :]    # (p*p, cols)
    beta_row = jnp.tile(ln_beta.astype(jnp.float32), p * p).reshape(1, cols)

    # --- H-tile sizing: generation-aware VMEM budget, explicit scoped limit ---
    vmem_cap = _vmem_capacity_bytes()
    # Per H-row f32 bytes: double-buffered in/out blocks + ~3 live (R, cols)
    # intermediates in the body.
    per_row = 4 * W * (2 * dim + 5 * cols)
    fixed = 4 * (2 * dim * cols + 4 * cols * p * p + cols) + (2 << 20)
    budget = min(int(vmem_cap * 0.45), 56 * 1024 * 1024)
    th = max(1, min(H, (budget - fixed) // per_row))
    if tile_h is not None:
        th = max(1, min(H, int(tile_h)))
    n_h = pl.cdiv(H, th)
    grid = (B, n_h)
    vmem_limit = int(min(vmem_cap * 0.85, 120 * 1024 * 1024))

    cost = pl.CostEstimate(
        flops=2 * B * H * W * cols * (dim + 2 * p * p),
        transcendentals=B * H * W * p * p,
        bytes_accessed=4 * (B * H * W * dim * (1 + p * p) + dim * cols))

    out5 = pl.pallas_call(
        functools.partial(_expand_ln_kernel, p=p, eps=eps),
        out_shape=jax.ShapeDtypeStruct((B, H, p, W, p * dim), x.dtype),
        grid=grid,
        in_specs=[
            pl.BlockSpec((1, th, W, dim), lambda b, hi: (b, hi, 0, 0)),
            pl.BlockSpec((dim, cols), lambda b, hi: (0, 0)),
            pl.BlockSpec((cols, p * p), lambda b, hi: (0, 0)),
            pl.BlockSpec((p * p, cols), lambda b, hi: (0, 0)),
            pl.BlockSpec((1, cols), lambda b, hi: (0, 0)),
        ],
        out_specs=pl.BlockSpec((1, th, p, W, p * dim),
                               lambda b, hi: (b, hi, 0, 0, 0)),
        compiler_params=pltpu.CompilerParams(
            dimension_semantics=("parallel", "parallel"),
            vmem_limit_bytes=vmem_limit),
        cost_estimate=cost,
    )(x_nhwc, w_c, pool, bcast_gamma, beta_row)

    # (B, H, p1, W, p2*dim) is memory-identical to NHWC (B, pH, pW, dim): free reshape.
    y_nhwc = out5.reshape(B, p * H, p * W, dim)
    if not nchw_output:
        return y_nhwc
    # Mandatory NHWC -> NCHW for the module's output contract.  The required
    # (w, p2) -> channel-major lane interleave is not expressible with relayout
    # ops Mosaic lowers reliably, so it remains a single XLA pass.
    # TODO(synk): call with nchw_output=False if the consumer accepts NHWC; that
    # removes the last full-size HBM pass (~1.8-2.5x end-to-end).
    return jnp.transpose(y_nhwc, (0, 3, 1, 2))


def _reference(x, w_expand, ln_gamma, ln_beta, *, dim_scale=4, eps=1e-5):
    B, dim, H, W = x.shape
    t = jnp.transpose(x.reshape(B, dim, H * W), (0, 2, 1))          # (B, L, dim)
    t = jnp.einsum("blc,oc->blo", t, w_expand)                      # (B, L, 16*dim)
    t = t.reshape(B, H, W, dim_scale, dim_scale, dim)
    t = jnp.transpose(t, (0, 1, 3, 2, 4, 5)).reshape(B, -1, dim)
    mean = jnp.mean(t, axis=-1, keepdims=True)
    var = jnp.mean((t - mean) ** 2, axis=-1, keepdims=True)
    t = (t - mean) * lax.rsqrt(var + eps) * ln_gamma + ln_beta
    t = t.reshape(B, dim_scale * H, dim_scale * W, dim)
    return jnp.transpose(t, (0, 3, 1, 2))


if __name__ == "__main__":
    dim_scale = 4

    def _run_case(B, dim, H, W, seed, tile_h=None):
        key = jax.random.PRNGKey(seed)
        kx, kw, kg, kb = jax.random.split(key, 4)
        x = jax.random.normal(kx, (B, dim, H, W), dtype=jnp.float32)
        # nn.Linear(dim, dim_scale**2 * dim, bias=False): weight (out, in)
        w_expand = jax.random.normal(kw, (dim_scale * dim_scale * dim, dim),
                                     dtype=jnp.float32) * 0.05
        ln_gamma = 1.0 + 0.1 * jax.random.normal(kg, (dim,), dtype=jnp.float32)
        ln_beta = 0.1 * jax.random.normal(kb, (dim,), dtype=jnp.float32)

        fn = jax.jit(functools.partial(swin_expand_x4, dim_scale=dim_scale,
                                       tile_h=tile_h))
        out = jax.block_until_ready(fn(x, w_expand, ln_gamma, ln_beta))
        assert out.shape == (B, dim, dim_scale * H, dim_scale * W), out.shape

        ref = jax.block_until_ready(
            _reference(x, w_expand, ln_gamma, ln_beta, dim_scale=dim_scale))
        # Tolerance covers MXU pass precision + summation-order differences of
        # the mean-folded weight vs. the XLA reference; outputs are O(1) after
        # LayerNorm, so a layout/permutation bug would blow well past this.
        err = float(jnp.max(jnp.abs(out - ref)))
        assert err < 3e-2, err
        return err

    _run_case(2, 32, 8, 8, seed=0)              # even tiles
    _run_case(1, 32, 6, 8, seed=1, tile_h=4)    # ragged last H-tile (masked writeback)
    print("KERNEL_OK")
</pallas_src>

<mosaic_0001>
module attributes {stable_mosaic.version = 11 : i64} {
  func.func @_expand_ln_kernel(%arg0: i32, %arg1: i32, %arg2: memref<1x8x8x32xf32, #tpu.memory_space<vmem>>, %arg3: memref<32x512xf32, #tpu.memory_space<vmem>>, %arg4: memref<512x16xf32, #tpu.memory_space<vmem>>, %arg5: memref<16x512xf32, #tpu.memory_space<vmem>>, %arg6: memref<1x512xf32, #tpu.memory_space<vmem>>, %arg7: memref<1x8x4x8x128xf32, #tpu.memory_space<vmem>>) attributes {dimension_semantics = [#tpu.dimension_semantics<parallel>, #tpu.dimension_semantics<parallel>], iteration_bounds = array<i64: 2, 1>, scalar_prefetch = 0 : i64, scratch_operands = 0 : i64, tpu.core_type = #tpu.core_type<tc>, window_params = [{transform_indices = @transform_0, window_bounds = array<i64: 1, 8, 8, 32>}, {pipeline_mode = #tpu.pipeline_mode<synchronous>, transform_indices = @transform_1, window_bounds = array<i64: 32, 512>}, {pipeline_mode = #tpu.pipeline_mode<synchronous>, transform_indices = @transform_2, window_bounds = array<i64: 512, 16>}, {pipeline_mode = #tpu.pipeline_mode<synchronous>, transform_indices = @transform_3, window_bounds = array<i64: 16, 512>}, {pipeline_mode = #tpu.pipeline_mode<synchronous>, transform_indices = @transform_4, window_bounds = array<i64: 1, 512>}, {transform_indices = @transform_5, window_bounds = array<i64: 1, 8, 4, 8, 128>}]} {
    %c0 = arith.constant 0 : index
    %c0_0 = arith.constant 0 : index
    %c0_1 = arith.constant 0 : index
    %c0_2 = arith.constant 0 : index
    %0 = vector.load %arg2[%c0, %c0_0, %c0_1, %c0_2] : memref<1x8x8x32xf32, #tpu.memory_space<vmem>>, vector<1x8x8x32xf32>
    %1 = vector.shape_cast %0 : vector<1x8x8x32xf32> to vector<64x32xf32>
    %c0_3 = arith.constant 0 : index
    %c0_4 = arith.constant 0 : index
    %2 = vector.load %arg3[%c0_3, %c0_4] : memref<32x512xf32, #tpu.memory_space<vmem>>, vector<32x512xf32>
    %cst = arith.constant dense<0.000000e+00> : vector<64x512xf32>
    %3 = tpu.matmul %1, %2, %cst {dimension_numbers = #tpu.dot_dimension_numbers<[1], [0], [0], [1], [0, 0, 1, 1], [], []>} : vector<64x32xf32>, vector<32x512xf32>, vector<64x512xf32> -> vector<64x512xf32>
    %4 = arith.mulf %3, %3 : vector<64x512xf32>
    %c0_5 = arith.constant 0 : index
    %c0_6 = arith.constant 0 : index
    %5 = vector.load %arg4[%c0_5, %c0_6] : memref<512x16xf32, #tpu.memory_space<vmem>>, vector<512x16xf32>
    %cst_7 = arith.constant dense<0.000000e+00> : vector<64x16xf32>
    %6 = tpu.matmul %4, %5, %cst_7 {dimension_numbers = #tpu.dot_dimension_numbers<[1], [0], [0], [1], [0, 0, 1, 1], [], []>} : vector<64x512xf32>, vector<512x16xf32>, vector<64x16xf32> -> vector<64x16xf32>
    %cst_8 = arith.constant 9.99999974E-6 : f32
    %7 = vector.broadcast %cst_8 : f32 to vector<64x16xf32>
    %8 = arith.addf %6, %7 : vector<64x16xf32>
    %9 = math.rsqrt %8 : vector<64x16xf32>
    %c0_9 = arith.constant 0 : index
    %c0_10 = arith.constant 0 : index
    %10 = vector.load %arg5[%c0_9, %c0_10] : memref<16x512xf32, #tpu.memory_space<vmem>>, vector<16x512xf32>
    %cst_11 = arith.constant dense<0.000000e+00> : vector<64x512xf32>
    %11 = tpu.matmul %9, %10, %cst_11 {dimension_numbers = #tpu.dot_dimension_numbers<[1], [0], [0], [1], [0, 0, 1, 1], [], []>} : vector<64x16xf32>, vector<16x512xf32>, vector<64x512xf32> -> vector<64x512xf32>
    %12 = arith.mulf %3, %11 : vector<64x512xf32>
    %c0_12 = arith.constant 0 : index
    %c0_13 = arith.constant 0 : index
    %13 = vector.load %arg6[%c0_12, %c0_13] : memref<1x512xf32, #tpu.memory_space<vmem>>, vector<1x512xf32>
    %14 = vector.broadcast %13 : vector<1x512xf32> to vector<64x512xf32>
    %15 = arith.addf %12, %14 : vector<64x512xf32>
    %16 = vector.extract_strided_slice %15 {offsets = [0, 0], sizes = [64, 128], strides = [1, 1]} : vector<64x512xf32> to vector<64x128xf32>
    %17 = vector.shape_cast %16 : vector<64x128xf32> to vector<8x8x128xf32>
    %c0_14 = arith.constant 0 : index
    %c0_15 = arith.constant 0 : index
    %c0_16 = arith.constant 0 : index
    %c0_17 = arith.constant 0 : index
    %c0_18 = arith.constant 0 : index
    %18 = vector.load %arg7[%c0_14, %c0_15, %c0_16, %c0_17, %c0_18] : memref<1x8x4x8x128xf32, #tpu.memory_space<vmem>>, vector<1x8x1x8x128xf32>
    %19 = vector.shape_cast %18 : vector<1x8x1x8x128xf32> to vector<8x8x128xf32>
    %20 = vector.shape_cast %17 : vector<8x8x128xf32> to vector<1x8x1x8x128xf32>
    tpu.vector_store %arg7[%c0_14, %c0_15, %c0_16, %c0_17, %c0_18], %20 {strides = array<i32>} : memref<1x8x4x8x128xf32, #tpu.memory_space<vmem>>, vector<1x8x1x8x128xf32>,
    %21 = vector.extract_strided_slice %15 {offsets = [0, 128], sizes = [64, 128], strides = [1, 1]} : vector<64x512xf32> to vector<64x128xf32>
    %22 = vector.shape_cast %21 : vector<64x128xf32> to vector<8x8x128xf32>
    %c0_19 = arith.constant 0 : index
    %c0_20 = arith.constant 0 : index
    %c1 = arith.constant 1 : index
    %c0_21 = arith.constant 0 : index
    %c0_22 = arith.constant 0 : index
    %23 = vector.load %arg7[%c0_19, %c0_20, %c1, %c0_21, %c0_22] : memref<1x8x4x8x128xf32, #tpu.memory_space<vmem>>, vector<1x8x1x8x128xf32>
    %24 = vector.shape_cast %23 : vector<1x8x1x8x128xf32> to vector<8x8x128xf32>
    %25 = vector.shape_cast %22 : vector<8x8x128xf32> to vector<1x8x1x8x128xf32>
    tpu.vector_store %arg7[%c0_19, %c0_20, %c1, %c0_21, %c0_22], %25 {strides = array<i32>} : memref<1x8x4x8x128xf32, #tpu.memory_space<vmem>>, vector<1x8x1x8x128xf32>,
    %26 = vector.extract_strided_slice %15 {offsets = [0, 256], sizes = [64, 128], strides = [1, 1]} : vector<64x512xf32> to vector<64x128xf32>
    %27 = vector.shape_cast %26 : vector<64x128xf32> to vector<8x8x128xf32>
    %c0_23 = arith.constant 0 : index
    %c0_24 = arith.constant 0 : index
    %c2 = arith.constant 2 : index
    %c0_25 = arith.constant 0 : index
    %c0_26 = arith.constant 0 : index
    %28 = vector.load %arg7[%c0_23, %c0_24, %c2, %c0_25, %c0_26] : memref<1x8x4x8x128xf32, #tpu.memory_space<vmem>>, vector<1x8x1x8x128xf32>
    %29 = vector.shape_cast %28 : vector<1x8x1x8x128xf32> to vector<8x8x128xf32>
    %30 = vector.shape_cast %27 : vector<8x8x128xf32> to vector<1x8x1x8x128xf32>
    tpu.vector_store %arg7[%c0_23, %c0_24, %c2, %c0_25, %c0_26], %30 {strides = array<i32>} : memref<1x8x4x8x128xf32, #tpu.memory_space<vmem>>, vector<1x8x1x8x128xf32>,
    %31 = vector.extract_strided_slice %15 {offsets = [0, 384], sizes = [64, 128], strides = [1, 1]} : vector<64x512xf32> to vector<64x128xf32>
    %32 = vector.shape_cast %31 : vector<64x128xf32> to vector<8x8x128xf32>
    %c0_27 = arith.constant 0 : index
    %c0_28 = arith.constant 0 : index
    %c3 = arith.constant 3 : index
    %c0_29 = arith.constant 0 : index
    %c0_30 = arith.constant 0 : index
    %33 = vector.load %arg7[%c0_27, %c0_28, %c3, %c0_29, %c0_30] : memref<1x8x4x8x128xf32, #tpu.memory_space<vmem>>, vector<1x8x1x8x128xf32>
    %34 = vector.shape_cast %33 : vector<1x8x1x8x128xf32> to vector<8x8x128xf32>
    %35 = vector.shape_cast %32 : vector<8x8x128xf32> to vector<1x8x1x8x128xf32>
    tpu.vector_store %arg7[%c0_27, %c0_28, %c3, %c0_29, %c0_30], %35 {strides = array<i32>} : memref<1x8x4x8x128xf32, #tpu.memory_space<vmem>>, vector<1x8x1x8x128xf32>,
    return
  }
  func.func @transform_0(%arg0: i32, %arg1: i32) -> (i32, i32, i32, i32) {
    %c0_i32 = arith.constant 0 : i32
    %c0_i32_0 = arith.constant 0 : i32
    %c0_i32_1 = arith.constant 0 : i32
    return %arg0, %arg1, %c0_i32, %c0_i32_0 : i32, i32, i32, i32
  }
  func.func @transform_1(%arg0: i32, %arg1: i32) -> (i32, i32) {
    %c0_i32 = arith.constant 0 : i32
    %c0_i32_0 = arith.constant 0 : i32
    %c0_i32_1 = arith.constant 0 : i32
    return %c0_i32, %c0_i32_0 : i32, i32
  }
  func.func @transform_2(%arg0: i32, %arg1: i32) -> (i32, i32) {
    %c0_i32 = arith.constant 0 : i32
    %c0_i32_0 = arith.constant 0 : i32
    %c0_i32_1 = arith.constant 0 : i32
    return %c0_i32, %c0_i32_0 : i32, i32
  }
  func.func @transform_3(%arg0: i32, %arg1: i32) -> (i32, i32) {
    %c0_i32 = arith.constant 0 : i32
    %c0_i32_0 = arith.constant 0 : i32
    %c0_i32_1 = arith.constant 0 : i32
    return %c0_i32, %c0_i32_0 : i32, i32
  }
  func.func @transform_4(%arg0: i32, %arg1: i32) -> (i32, i32) {
    %c0_i32 = arith.constant 0 : i32
    %c0_i32_0 = arith.constant 0 : i32
    %c0_i32_1 = arith.constant 0 : i32
    return %c0_i32, %c0_i32_0 : i32, i32
  }
  func.func @transform_5(%arg0: i32, %arg1: i32) -> (i32, i32, i32, i32, i32) {
    %c0_i32 = arith.constant 0 : i32
    %c0_i32_0 = arith.constant 0 : i32
    %c0_i32_1 = arith.constant 0 : i32
    %c0_i32_2 = arith.constant 0 : i32
    return %arg0, %arg1, %c0_i32, %c0_i32_0, %c0_i32_1 : i32, i32, i32, i32, i32
  }
}

</mosaic_0001>

<bundles_post_ra>
// kernel: tile.13
= control target key start
LH: loop header
LB: loop body
LE: loop exit
PB: predicated region body
PF: predicated region fallthrough
CT: control target
= control target key end

     0   :  { %s28_s0 = inlined_call_operand.vmem [shape: f32[32], index: 0, kind: input, shape index: {}]   ;;  %s29_s1 = inlined_call_operand.vmem [shape: f32[16,32], index: 1, kind: output, shape index: {}]  }
   0x1   :  { %v4_v0 = vld [vmem:[%s28_s0] ss:$0 sm:$0xff] }
   0x2   :  { %5 = vst [vmem:[%s29_s1] sm:$0xff] %v4_v0  ;;  %8 = vst [vmem:[%s29_s1 + $0x8] sm:$0xff] %v4_v0 }

// kernel: mul.5
= control target key start
LH: loop header
LB: loop body
LE: loop exit
PB: predicated region body
PF: predicated region fallthrough
CT: control target
= control target key end

     0   :  { %s37_s8 = smov 96   ;;  %vm3_vm0 = vcmask 261120   ;;  %s39_s15 = smov 64   ;;  %vm9_vm1 = vcmask 1048320   ;;  %vm15_vm2 = vcmask 785920   ;;  %vm21_vm3 = vcmask 523520   ;;  %s65_s0 = inlined_call_operand.vmem [shape: f32[16,32], index: 0, kind: input, shape index: {}]   ;;  %s66_s1 = inlined_call_operand.vmem [shape: f32[512], index: 1, kind: output, shape index: {}]  }
   0x1   :  { %v31_v0 = vld [vmem:[%s65_s0 + $0x3] ss:$4 sm:$0xf]   ;;  %v32_v1 = vld [vmem:[%s65_s0 + $0x2] ss:$4 sm:$0xf]  }
   0x2   :  { %7 = vrot.lane.b32.xlu0 %v31_v0, %s37_s8  ;;  %v33_v2 = vld [vmem:[%s65_s0 + $0x1] ss:$4 sm:$0xf]   ;;  %v2_v3 = vld [vmem:[%s65_s0] ss:$4 sm:$0xf]  }
   0x3   :  { %s38_s0 = smov 32   ;;  %4 = vst.msk [vmem:[#allocation0] sm:$0xf] %vm3_vm0, %v2_v3  }
   0x4   :  { %19 = vrot.lane.b32.xlu1 %v33_v2, %s38_s0 }
   0x6   :  { %13 = vrot.lane.b32.xlu0 %v32_v1, %s39_s15 }
  0x74   :  { %v8_v4 = vpop.permute.xlu0 %7  }
  0x75   :  { %10 = vst.msk [vmem:[#allocation0] sm:$0xf] %vm9_vm1, %v8_v4  }
  0x76   :  { %v20_v5 = vpop.permute.xlu1 %19  }
  0x78   :  { %v14_v6 = vpop.permute.xlu0 %13  }
  0x79   :  { %16 = vst.msk [vmem:[#allocation0] sm:$0xf] %vm15_vm2, %v14_v6  }
  0x7a   :  { %22 = vst.msk [vmem:[#allocation0] sm:$0xf] %vm21_vm3, %v20_v5  }
  0x81   :  { %v27_v7 = vld [vmem:[#allocation0] sm:$0xf] }
  0x82   :  { %30 = vst [vmem:[%s66_s1] sm:$0xf] %v27_v7 }

// kernel: tile.19
= control target key start
LH: loop header
LB: loop body
LE: loop exit
PB: predicated region body
PF: predicated region fallthrough
CT: control target
= control target key end

     0   :  { %s62_s8 = smov 96   ;;  %vm3_vm0 = vcmask 261120   ;;  %s64_s15 = smov 64   ;;  %vm9_vm1 = vcmask 1048320   ;;  %vm15_vm2 = vcmask 785920   ;;  %vm21_vm3 = vcmask 523520   ;;  %s99_s0 = inlined_call_operand.vmem [shape: f32[16,32], index: 0, kind: input, shape index: {}]   ;;  %s100_s1 = inlined_call_operand.vmem [shape: f32[1,512], index: 1, kind: output, shape index: {}]  }
   0x1   :  { %v53_v0 = vld [vmem:[%s99_s0 + $0x3] ss:$4 sm:$0xf]   ;;  %v54_v1 = vld [vmem:[%s99_s0 + $0x2] ss:$4 sm:$0xf]  }
   0x2   :  { %7 = vrot.lane.b32.xlu0 %v53_v0, %s62_s8  ;;  %v55_v2 = vld [vmem:[%s99_s0 + $0x1] ss:$4 sm:$0xf]   ;;  %v2_v3 = vld [vmem:[%s99_s0] ss:$4 sm:$0xf]  }
   0x3   :  { %s63_s0 = smov 32   ;;  %4 = vst.msk [vmem:[#allocation0] ss:$8 sm:$0xf] %vm3_vm0, %v2_v3  }
   0x4   :  { %19 = vrot.lane.b32.xlu1 %v55_v2, %s63_s0 }
   0x6   :  { %13 = vrot.lane.b32.xlu0 %v54_v1, %s64_s15 }
  0x74   :  { %v8_v4 = vpop.permute.xlu0 %7  }
  0x75   :  { %10 = vst.msk [vmem:[#allocation0] ss:$8 sm:$0xf] %vm9_vm1, %v8_v4  }
  0x76   :  { %v20_v5 = vpop.permute.xlu1 %19  }
  0x78   :  { %v14_v6 = vpop.permute.xlu0 %13  }
  0x79   :  { %16 = vst.msk [vmem:[#allocation0] ss:$8 sm:$0xf] %vm15_vm2, %v14_v6  }
  0x7a   :  { %22 = vst.msk [vmem:[#allocation0] ss:$8 sm:$0xf] %vm21_vm3, %v20_v5  }
  0x81   :  { %v27_v7 = vld [vmem:[#allocation0] sm:$0x1]  ;;  %v32_v8 = vld [vmem:[#allocation0 + $0x8] sm:$0x1]  ;;  %v38_v9 = vld [vmem:[#allocation0 + $0x10] sm:$0x1] }
  0x82   :  { %30 = vst [vmem:[%s100_s1] sm:$0x1] %v27_v7  ;;  %56 = vst [vmem:[%s100_s1 + $0x1] sm:$0x1] %v32_v8  ;;  %v45_v10 = vld [vmem:[#allocation0 + $0x18] sm:$0x1] }
  0x83   :  { %57 = vst [vmem:[%s100_s1 + $0x2] sm:$0x1] %v38_v9  ;;  %58 = vst [vmem:[%s100_s1 + $0x3] sm:$0x1] %v45_v10 }

// kernel: swin_expand_x4.1
= control target key start
LH: loop header
LB: loop body
LE: loop exit
PB: predicated region body
PF: predicated region fallthrough
CT: control target
= control target key end

     0   :  { %s1605_s18 = smov 0   ;;  %s1607_s19 = smov 0   ;;  %s2217_s0 = inlined_call_operand.vmem [shape: f32[2,8,8,32], index: 0, kind: input, shape index: {}]   ;;  %s2218_s1 = inlined_call_operand.vmem [shape: f32[32,512], index: 1, kind: input, shape index: {}]   ;;  %s2219_s2 = inlined_call_operand.vmem [shape: f32[512,16], index: 2, kind: input, shape index: {}]   ;;  %s2220_s3 = inlined_call_operand.vmem [shape: f32[16,512], index: 3, kind: input, shape index: {}]   ;;  %s2221_s4 = inlined_call_operand.vmem [shape: f32[1,512], index: 4, kind: input, shape index: {}]   ;;  %s2222_s5 = inlined_call_operand.vmem [shape: f32[2,8,4,8,128], index: 5, kind: output, shape index: {}]  }
   0x1   :  { %s1609_s20 = smov 0  }
   0x2 LB: > { %s27_s21 = sadd.s32 1, %s1568_s19  ;;  %p1332_p0 = scmp.ge.s32.totalorder %s1572_s20, 1  ;;  %s1572_s20 = sphi %s1609_s20, %s15_s20   ;;  %s1568_s19 = sphi %s1607_s19, %s2224_s19   ;;  %s1564_s18 = sphi %s1605_s18, %s2223_s18  }
   0x3   : > { %p29_p1 = scmp.ge.s32.totalorder %s27_s21, 2  ;;  %p208_p2 = scmp.lt.s32.totalorder %s1572_s20, 3 }
   0x5   : > { %s2226_s21 = smov (%p29_p1, %s27_s21), 0  ;;  %p209_p3 = pnand %p1332_p0, %p208_p2 }
   0x6   : > { %p246_p4 = scmp.lt.s32.totalorder (!%p209_p3), %s1564_s18, 1 }
   0x7   : > { %212 = sbr.rel (%p209_p3) target bundleno = 663 (0x297), region = 40 }
   0xc   : > { %v287_v0 = vld [vmem:[%s2218_s1 + $0x68] sm:$0xff]  ;;  %v289_v1 = vld [vmem:[%s2218_s1 + $0x78] sm:$0xff]  ;;  %v286_v2 = vld [vmem:[%s2218_s1 + $0x60] sm:$0xff]  ;;  %s2228_s18 = smov (!%p246_p4, %s1564_s18), 1  ;;  %vm290_vm0 = vcmask 261120   ;;  %v1574_v17 = vmov 0.0  }
   0xd   : > { %339 = vmatprep.subr.mxu0 %v287_v0  ;;  %452 = vmatprep.subr.mxu1 %v289_v1  ;;  %v288_v3 = vld [vmem:[%s2218_s1 + $0x70] sm:$0xff]  ;;  %v283_v4 = vld [vmem:[%s2218_s1 + $0x48] sm:$0xff]  ;;  %v285_v5 = vld [vmem:[%s2218_s1 + $0x58] sm:$0xff]  ;;  %s1395_s29 = sshll.u32 %s2228_s18, 6  ;;  %vm863_vm1 = vcmask 130048   ;;  %s1396_s14 = sshll.u32 %s2228_s18, 8 }
   0xe   : > { %340 = vmatpush1.msra.mxu0 %v286_v2  ;;  %453 = vmatpush1.msra.mxu1 %v288_v3  ;;  %v282_v6 = vld [vmem:[%s2218_s1 + $0x40] sm:$0xff]  ;;  %v284_v7 = vld [vmem:[%s2218_s1 + $0x50] sm:$0xff]  ;;  %v279_v8 = vld [vmem:[%s2218_s1 + $0x28] sm:$0xff]  ;;  %s1674_s9 = scalar_lea.vmem %s2217_s0, %s1395_s29  ;;  %s2112_s16 = scalar_lea.vmem %s2222_s5, %s1396_s14 }
   0xf   : > { %341 = vmatprep.subr.mxu0 %v283_v4  ;;  %454 = vmatprep.subr.mxu1 %v285_v5  ;;  %v281_v9 = vld [vmem:[%s2218_s1 + $0x38] sm:$0xff]  ;;  %v278_v10 = vld [vmem:[%s2218_s1 + $0x20] sm:$0xff]  ;;  %v280_v11 = vld [vmem:[%s2218_s1 + $0x30] sm:$0xff] }
  0x10   : > { %342 = vmatpush1.msra.mxu0 %v282_v6  ;;  %455 = vmatpush1.msra.mxu1 %v284_v7  ;;  %v275_v12 = vld [vmem:[%s2218_s1 + $0x8] sm:$0xff]  ;;  %v277_v13 = vld [vmem:[%s2218_s1 + $0x18] sm:$0xff]  ;;  %v274_v14 = vld [vmem:[%s2218_s1] sm:$0xff] }
  0x11   : > { %343 = vmatprep.subr.mxu0 %v279_v8  ;;  %456 = vmatprep.subr.mxu1 %v281_v9  ;;  %v276_v15 = vld [vmem:[%s2218_s1 + $0x10] sm:$0xff]  ;;  %v266_v16 = vld [vmem:[%s1674_s9] sm:$0xff]  ;;  %v604_v18 = vld [vmem:[%s2219_s2 + $0xf8] sm:$0xff] }
  0x12   : > { %344 = vmatpush1.msra.mxu0 %v278_v10  ;;  %457 = vmatpush1.msra.mxu1 %v280_v11  ;;  %v636_v19 = vld [vmem:[%s2219_s2 + $0x1f8] sm:$0xff]  ;;  %v267_v22 = vld [vmem:[%s1674_s9 + $0x8] sm:$0xff]  ;;  %v603_v23 = vld [vmem:[%s2219_s2 + $0xf0] sm:$0xff] }
  0x13   : > { %345 = vmatprep.subr.mxu0 %v275_v12  ;;  %458 = vmatprep.subr.mxu1 %v277_v13  ;;  %v588_v20 = vld [vmem:[%s2219_s2 + $0x78] sm:$0xff]  ;;  %v635_v24 = vld [vmem:[%s2219_s2 + $0x1f0] sm:$0xff]  ;;  %v602_v28 = vld [vmem:[%s2219_s2 + $0xe8] sm:$0xff] }
  0x14   : > { %346 = vmatpush1.msra.mxu0 %v274_v14  ;;  %379 = vmatprep.mubr.f32.mxu0 %v1574_v17  ;;  %v620_v21 = vld [vmem:[%s2219_s2 + $0x178] sm:$0xff]  ;;  %v587_v25 = vld [vmem:[%s2219_s2 + $0x70] sm:$0xff]  ;;  %v634_v29 = vld [vmem:[%s2219_s2 + $0x1e8] sm:$0xff] }
  0x15   : > { %459 = vmatpush1.msra.mxu1 %v276_v15  ;;  %492 = vmatprep.mubr.f32.mxu1 %v1574_v17  ;;  %v619_v26 = vld [vmem:[%s2219_s2 + $0x170] sm:$0xff]  ;;  %v586_v30 = vld [vmem:[%s2219_s2 + $0x68] sm:$0xff]  ;;  %v269_v32 = vld [vmem:[%s1674_s9 + $0x18] sm:$0xff] }
  0x16   : > { %1337 = vmatmul.mubr.msk.f32.vlgmr.msra.gmra.mxu0 %vm290_vm0, %v266_v16  ;;  %1345 = vmatmul.mubr.msk.f32.vlgmr.msra.gmra.mxu1 %vm290_vm0, %v266_v16  ;;  %v268_v27 = vld [vmem:[%s1674_s9 + $0x10] sm:$0xff]  ;;  %v618_v31 = vld [vmem:[%s2219_s2 + $0x168] sm:$0xff]  ;;  %v601_v33 = vld [vmem:[%s2219_s2 + $0xe0] sm:$0xff] }
  0x17   : > { %385 = vmatprep.mubr.f32.mxu0 %v1574_v17  ;;  %498 = vmatprep.mubr.f32.mxu1 %v1574_v17  ;;  %v633_v34 = vld [vmem:[%s2219_s2 + $0x1e0] sm:$0xff]  ;;  %v600_v38 = vld [vmem:[%s2219_s2 + $0xd8] sm:$0xff]  ;;  %v271_v42 = vld [vmem:[%s1674_s9 + $0x28] sm:$0xff] }
  0x18   : > { %1397 = vmatprep.subr.mxu0 %v604_v18  ;;  %1453 = vmatprep.subr.mxu1 %v636_v19  ;;  %v585_v35 = vld [vmem:[%s2219_s2 + $0x60] sm:$0xff]  ;;  %v632_v39 = vld [vmem:[%s2219_s2 + $0x1d8] sm:$0xff]  ;;  %v599_v43 = vld [vmem:[%s2219_s2 + $0xd0] sm:$0xff] }
  0x19   : > { %1398 = vmatpush3.msra.mxu0 %v588_v20  ;;  %1454 = vmatpush3.msra.mxu1 %v620_v21  ;;  %v617_v36 = vld [vmem:[%s2219_s2 + $0x160] sm:$0xff]  ;;  %v584_v40 = vld [vmem:[%s2219_s2 + $0x58] sm:$0xff]  ;;  %v631_v44 = vld [vmem:[%s2219_s2 + $0x1d0] sm:$0xff] }
  0x1a   : > { %1338 = vmatmul.mubr.msk.f32.gmra.mxu0 %vm290_vm0, %v267_v22  ;;  %1346 = vmatmul.mubr.msk.f32.gmra.mxu1 %vm290_vm0, %v267_v22  ;;  %v270_v37 = vld [vmem:[%s1674_s9 + $0x20] sm:$0xff]  ;;  %v616_v41 = vld [vmem:[%s2219_s2 + $0x158] sm:$0xff]  ;;  %v583_v45 = vld [vmem:[%s2219_s2 + $0x50] sm:$0xff] }
  0x1b   : > { %391 = vmatprep.mubr.f32.mxu0 %v1574_v17  ;;  %504 = vmatprep.mubr.f32.mxu1 %v1574_v17  ;;  %v615_v46 = vld [vmem:[%s2219_s2 + $0x150] sm:$0xff]  ;;  %v598_v48 = vld [vmem:[%s2219_s2 + $0xc8] sm:$0xff]  ;;  %v273_v52 = vld [vmem:[%s1674_s9 + $0x38] sm:$0xff] }
  0x1c   : > { %1399 = vmatprep.subr.mxu0 %v603_v23  ;;  %1455 = vmatprep.subr.mxu1 %v635_v24  ;;  %v272_v47 = vld [vmem:[%s1674_s9 + $0x30] sm:$0xff]  ;;  %v630_v49 = vld [vmem:[%s2219_s2 + $0x1c8] sm:$0xff]  ;;  %v597_v53 = vld [vmem:[%s2219_s2 + $0xc0] sm:$0xff] }
  0x1d   : > { %1400 = vmatpush3.msra.mxu0 %v587_v25  ;;  %1456 = vmatpush3.msra.mxu1 %v619_v26  ;;  %v582_v50 = vld [vmem:[%s2219_s2 + $0x48] sm:$0xff]  ;;  %v629_v54 = vld [vmem:[%s2219_s2 + $0x1c0] sm:$0xff]  ;;  %v596_v57 = vld [vmem:[%s2219_s2 + $0xb8] sm:$0xff] }
  0x1e   : > { %1339 = vmatmul.mubr.msk.f32.gmra.mxu0 %vm290_vm0, %v268_v27  ;;  %1347 = vmatmul.mubr.msk.f32.gmra.mxu1 %vm290_vm0, %v268_v27  ;;  %v614_v51 = vld [vmem:[%s2219_s2 + $0x148] sm:$0xff]  ;;  %v581_v55 = vld [vmem:[%s2219_s2 + $0x40] sm:$0xff]  ;;  %v628_v58 = vld [vmem:[%s2219_s2 + $0x1b8] sm:$0xff] }
  0x1f   : > { %397 = vmatprep.mubr.f32.mxu0 %v1574_v17  ;;  %510 = vmatprep.mubr.f32.mxu1 %v1574_v17  ;;  %v613_v56 = vld [vmem:[%s2219_s2 + $0x140] sm:$0xff]  ;;  %v580_v59 = vld [vmem:[%s2219_s2 + $0x38] sm:$0xff]  ;;  %v595_v61 = vld [vmem:[%s2219_s2 + $0xb0] sm:$0xff] }
  0x20   : > { %1401 = vmatprep.subr.mxu0 %v602_v28  ;;  %1457 = vmatprep.subr.mxu1 %v634_v29  ;;  %v612_v60 = vld [vmem:[%s2219_s2 + $0x138] sm:$0xff]  ;;  %v627_v62 = vld [vmem:[%s2219_s2 + $0x1b0] sm:$0xff]  ;;  %v594_v1 = vld [vmem:[%s2219_s2 + $0xa8] sm:$0xff] }
  0x21   : > { %1402 = vmatpush3.msra.mxu0 %v586_v30  ;;  %1458 = vmatpush3.msra.mxu1 %v618_v31  ;;  %v579_v63 = vld [vmem:[%s2219_s2 + $0x30] sm:$0xff]  ;;  %v626_v2 = vld [vmem:[%s2219_s2 + $0x1a8] sm:$0xff]  ;;  %v593_v5 = vld [vmem:[%s2219_s2 + $0xa0] sm:$0xff] }
  0x22   : > { %1340 = vmatmul.mubr.msk.f32.gmra.mxu0 %vm290_vm0, %v269_v32  ;;  %1348 = vmatmul.mubr.msk.f32.gmra.mxu1 %vm290_vm0, %v269_v32  ;;  %v611_v0 = vld [vmem:[%s2219_s2 + $0x130] sm:$0xff]  ;;  %v578_v3 = vld [vmem:[%s2219_s2 + $0x28] sm:$0xff]  ;;  %v625_v6 = vld [vmem:[%s2219_s2 + $0x1a0] sm:$0xff] }
  0x23   : > { %403 = vmatprep.mubr.f32.mxu0 %v1574_v17  ;;  %516 = vmatprep.mubr.f32.mxu1 %v1574_v17  ;;  %v610_v4 = vld [vmem:[%s2219_s2 + $0x128] sm:$0xff]  ;;  %v577_v7 = vld [vmem:[%s2219_s2 + $0x20] sm:$0xff]  ;;  %v592_v9 = vld [vmem:[%s2219_s2 + $0x98] sm:$0xff] }
  0x24   : > { %1403 = vmatprep.subr.mxu0 %v601_v33  ;;  %1459 = vmatprep.subr.mxu1 %v633_v34  ;;  %v609_v8 = vld [vmem:[%s2219_s2 + $0x120] sm:$0xff]  ;;  %v624_v10 = vld [vmem:[%s2219_s2 + $0x198] sm:$0xff]  ;;  %v591_v13 = vld [vmem:[%s2219_s2 + $0x90] sm:$0xff] }
  0x25   : > { %1404 = vmatpush3.msra.mxu0 %v585_v35  ;;  %1460 = vmatpush3.msra.mxu1 %v617_v36  ;;  %v576_v11 = vld [vmem:[%s2219_s2 + $0x18] sm:$0xff]  ;;  %v623_v14 = vld [vmem:[%s2219_s2 + $0x190] sm:$0xff]  ;;  %v590_v18 = vld [vmem:[%s2219_s2 + $0x88] sm:$0xff] }
  0x26   : > { %1341 = vmatmul.mubr.msk.f32.gmra.mxu0 %vm290_vm0, %v270_v37  ;;  %1349 = vmatmul.mubr.msk.f32.gmra.mxu1 %vm290_vm0, %v270_v37  ;;  %v608_v12 = vld [vmem:[%s2219_s2 + $0x118] sm:$0xff]  ;;  %v575_v15 = vld [vmem:[%s2219_s2 + $0x10] sm:$0xff]  ;;  %v622_v19 = vld [vmem:[%s2219_s2 + $0x188] sm:$0xff] }
  0x27   : > { %409 = vmatprep.mubr.f32.mxu0 %v1574_v17  ;;  %522 = vmatprep.mubr.f32.mxu1 %v1574_v17  ;;  %v607_v16 = vld [vmem:[%s2219_s2 + $0x110] sm:$0xff]  ;;  %v574_v20 = vld [vmem:[%s2219_s2 + $0x8] sm:$0xff]  ;;  %v589_v22 = vld [vmem:[%s2219_s2 + $0x80] sm:$0xff] }
  0x28   : > { %1405 = vmatprep.subr.mxu0 %v600_v38  ;;  %1461 = vmatprep.subr.mxu1 %v632_v39  ;;  %v606_v21 = vld [vmem:[%s2219_s2 + $0x108] sm:$0xff]  ;;  %v621_v23 = vld [vmem:[%s2219_s2 + $0x180] sm:$0xff]  ;;  %v862_v27 = vld [vmem:[%s2220_s3 + $0x38] sm:$0xff] }
  0x29   : > { %1406 = vmatpush3.msra.mxu0 %v584_v40  ;;  %1462 = vmatpush3.msra.mxu1 %v616_v41  ;;  %v573_v24 = vld [vmem:[%s2219_s2] sm:$0xff]  ;;  %v860_v26 = vld [vmem:[%s2220_s3 + $0x28] sm:$0xff]  ;;  %v861_v39 = vld [vmem:[%s2220_s3 + $0x30] sm:$0xff] }
  0x2a   : > { %1342 = vmatmul.mubr.msk.f32.gmra.mxu0 %vm290_vm0, %v271_v42  ;;  %1350 = vmatmul.mubr.msk.f32.gmra.mxu1 %vm290_vm0, %v271_v42  ;;  %v605_v25 = vld [vmem:[%s2219_s2 + $0x100] sm:$0xff] }
  0x2b   : > { %415 = vmatprep.mubr.f32.mxu0 %v1574_v17  ;;  %528 = vmatprep.mubr.f32.mxu1 %v1574_v17  ;;  %v859_v38 = vld [vmem:[%s2220_s3 + $0x20] sm:$0xff] }
  0x2c   : > { %1407 = vmatprep.subr.mxu0 %v599_v43  ;;  %1463 = vmatprep.subr.mxu1 %v631_v44 }
  0x2d   : > { %1408 = vmatpush3.msra.mxu0 %v583_v45  ;;  %1464 = vmatpush3.msra.mxu1 %v615_v46 }
  0x2e   : > { %1343 = vmatmul.mubr.msk.f32.gmra.mxu0 %vm290_vm0, %v272_v47  ;;  %1351 = vmatmul.mubr.msk.f32.gmra.mxu1 %vm290_vm0, %v272_v47 }
  0x2f   : > { %421 = vmatprep.mubr.f32.mxu0 %v1574_v17  ;;  %534 = vmatprep.mubr.f32.mxu1 %v1574_v17 }
  0x30   : > { %1409 = vmatprep.subr.mxu0 %v598_v48  ;;  %1465 = vmatprep.subr.mxu1 %v630_v49 }
  0x31   : > { %1410 = vmatpush3.msra.mxu0 %v582_v50  ;;  %1466 = vmatpush3.msra.mxu1 %v614_v51 }
  0x32   : > { %1344 = vmatmul.mubr.msk.f32.gmra.mxu0 %vm290_vm0, %v273_v52  ;;  %1352 = vmatmul.mubr.msk.f32.gmra.mxu1 %vm290_vm0, %v273_v52 }
  0x33   : > { %1411 = vmatprep.subr.mxu0 %v597_v53  ;;  %1467 = vmatprep.subr.mxu1 %v629_v54 }
  0x34   : > { %1412 = vmatpush3.msra.mxu0 %v581_v55  ;;  %1468 = vmatpush3.msra.mxu1 %v613_v56 }
  0x35   : > { %1413 = vmatprep.subr.mxu0 %v596_v57  ;;  %1469 = vmatprep.subr.mxu1 %v628_v58 }
  0x36   : > { %1414 = vmatpush3.msra.mxu0 %v580_v59  ;;  %1470 = vmatpush3.msra.mxu1 %v612_v60 }
  0x37   : > { %1415 = vmatprep.subr.mxu0 %v595_v61  ;;  %1471 = vmatprep.subr.mxu1 %v627_v62 }
  0x38   : > { %1416 = vmatpush3.msra.mxu0 %v579_v63  ;;  %1472 = vmatpush3.msra.mxu1 %v611_v0 }
  0x39   : > { %1417 = vmatprep.subr.mxu0 %v594_v1  ;;  %1473 = vmatprep.subr.mxu1 %v626_v2 }
  0x3a   : > { %1418 = vmatpush3.msra.mxu0 %v578_v3  ;;  %1474 = vmatpush3.msra.mxu1 %v610_v4 }
  0x3b   : > { %1419 = vmatprep.subr.mxu0 %v593_v5  ;;  %1475 = vmatprep.subr.mxu1 %v625_v6 }
  0x3c   : > { %1420 = vmatpush3.msra.mxu0 %v577_v7  ;;  %1476 = vmatpush3.msra.mxu1 %v609_v8 }
  0x3d   : > { %1421 = vmatprep.subr.mxu0 %v592_v9  ;;  %1477 = vmatprep.subr.mxu1 %v624_v10 }
  0x3e   : > { %1422 = vmatpush3.msra.mxu0 %v576_v11  ;;  %1478 = vmatpush3.msra.mxu1 %v608_v12 }
  0x3f   : > { %1423 = vmatprep.subr.mxu0 %v591_v13  ;;  %1479 = vmatprep.subr.mxu1 %v623_v14 }
  0x40   : > { %1424 = vmatpush3.msra.mxu0 %v575_v15  ;;  %1480 = vmatpush3.msra.mxu1 %v607_v16 }
  0x41   : > { %1425 = vmatprep.subr.mxu0 %v590_v18  ;;  %1481 = vmatprep.subr.mxu1 %v622_v19 }
  0x42   : > { %1426 = vmatpush3.msra.mxu0 %v574_v20  ;;  %1482 = vmatpush3.msra.mxu1 %v606_v21 }
  0x43   : > { %1427 = vmatprep.subr.mxu0 %v589_v22  ;;  %1483 = vmatprep.subr.mxu1 %v621_v23 }
  0x44   : > { %1428 = vmatpush3.msra.mxu0 %v573_v24  ;;  %1484 = vmatpush3.msra.mxu1 %v605_v25 }
  0x45   : > { %916 = vmatprep.subr.mxu0 %v860_v26  ;;  %1029 = vmatprep.subr.mxu1 %v862_v27 }
  0xd6   : > { %v1917_v28 = vpop.f32.mrf.mxu0  ;;  %v1919_v29 = vpop.f32.mrf.mxu1 }
  0xd7   : > { %v543_v30 = vmul.f32 %v1919_v29, %v1919_v29  ;;  %v541_v35 = vmul.f32 %v1917_v28, %v1917_v28 }
  0xd8   : > { %v1923_v31 = vpop.f32.mrf.mxu0  ;;  %v1925_v32 = vpop.f32.mrf.mxu1 }
  0xd9   : > { %v542_v33 = vmul.f32 %v1923_v31, %v1923_v31  ;;  %v544_v34 = vmul.f32 %v1925_v32, %v1925_v32 }
  0xda   : > { %v1933_v36 = vpop.f32.mrf.mxu0  ;;  %v1935_v37 = vpop.f32.mrf.mxu1 }
  0xdb   : > { %701 = vmatprep.mubr.f32.mxu0 %v542_v33  ;;  %806 = vmatprep.mubr.f32.mxu1 %v544_v34  ;;  %v547_v40 = vmul.f32 %v1935_v37, %v1935_v37  ;;  %v545_v45 = vmul.f32 %v1933_v36, %v1933_v36 }
  0xdc   : > { %v1945_v41 = vpop.f32.mrf.mxu0  ;;  %v1947_v42 = vpop.f32.mrf.mxu1  ;;  %702 = vmatmul.mubr.f32.vlgmr.msra.gmra.mxu0 %v541_v35  ;;  %807 = vmatmul.mubr.f32.vlgmr.msra.gmra.mxu1 %v543_v30  ;;  %v856_v35 = vld [vmem:[%s2220_s3 + $0x8] sm:$0xff] }
  0xdd   : > { %v546_v43 = vmul.f32 %v1945_v41, %v1945_v41  ;;  %v548_v44 = vmul.f32 %v1947_v42, %v1947_v42  ;;  %917 = vmatpush1.msra.mxu0 %v859_v38  ;;  %1030 = vmatpush1.msra.mxu1 %v861_v39  ;;  %v858_v38 = vld [vmem:[%s2220_s3 + $0x18] sm:$0xff]  ;;  %v855_v39 = vld [vmem:[%s2220_s3] sm:$0xff] }
  0xde   : > { %v1955_v46 = vpop.f32.mrf.mxu0  ;;  %v1957_v47 = vpop.f32.mrf.mxu1  ;;  %918 = vmatprep.subr.mxu0 %v856_v35  ;;  %1031 = vmatprep.subr.mxu1 %v858_v38 }
  0xdf   : > { %706 = vmatprep.mubr.f32.mxu0 %v546_v43  ;;  %811 = vmatprep.mubr.f32.mxu1 %v548_v44  ;;  %v551_v48 = vmul.f32 %v1957_v47, %v1957_v47  ;;  %v549_v53 = vmul.f32 %v1955_v46, %v1955_v46 }
  0xe0   : > { %v1961_v49 = vpop.f32.mrf.mxu0  ;;  %v1963_v50 = vpop.f32.mrf.mxu1  ;;  %707 = vmatmul.mubr.f32.gmra.mxu0 %v545_v45  ;;  %812 = vmatmul.mubr.f32.gmra.mxu1 %v547_v40  ;;  %v857_v40 = vld [vmem:[%s2220_s3 + $0x10] sm:$0xff] }
  0xe1   : > { %v550_v51 = vmul.f32 %v1961_v49, %v1961_v49  ;;  %v552_v52 = vmul.f32 %v1963_v50, %v1963_v50  ;;  %919 = vmatpush1.msra.mxu0 %v855_v39  ;;  %1032 = vmatpush1.msra.mxu1 %v857_v40 }
  0xe2   : > { %v1971_v54 = vpop.f32.mrf.mxu0  ;;  %v1973_v55 = vpop.f32.mrf.mxu1 }
  0xe3   : > { %711 = vmatprep.mubr.f32.mxu0 %v550_v51  ;;  %816 = vmatprep.mubr.f32.mxu1 %v552_v52  ;;  %v555_v56 = vmul.f32 %v1973_v55, %v1973_v55  ;;  %v553_v61 = vmul.f32 %v1971_v54, %v1971_v54 }
  0xe4   : > { %v1977_v57 = vpop.f32.mrf.mxu0  ;;  %v1979_v58 = vpop.f32.mrf.mxu1  ;;  %712 = vmatmul.mubr.f32.gmra.mxu0 %v549_v53  ;;  %817 = vmatmul.mubr.f32.gmra.mxu1 %v551_v48 }
  0xe5   : > { %v554_v59 = vmul.f32 %v1977_v57, %v1977_v57  ;;  %v556_v60 = vmul.f32 %v1979_v58, %v1979_v58 }
  0xe6   : > { %v1987_v62 = vpop.f32.mrf.mxu0  ;;  %v1989_v63 = vpop.f32.mrf.mxu1 }
  0xe7   : > { %716 = vmatprep.mubr.f32.mxu0 %v554_v59  ;;  %821 = vmatprep.mubr.f32.mxu1 %v556_v60  ;;  %v559_v0 = vmul.f32 %v1989_v63, %v1989_v63  ;;  %v557_v5 = vmul.f32 %v1987_v62, %v1987_v62 }
  0xe8   : > { %v1993_v1 = vpop.f32.mrf.mxu0  ;;  %v1995_v2 = vpop.f32.mrf.mxu1  ;;  %717 = vmatmul.mubr.f32.gmra.mxu0 %v553_v61  ;;  %822 = vmatmul.mubr.f32.gmra.mxu1 %v555_v56 }
  0xe9   : > { %v558_v3 = vmul.f32 %v1993_v1, %v1993_v1  ;;  %v560_v4 = vmul.f32 %v1995_v2, %v1995_v2 }
  0xea   : > { %v2003_v6 = vpop.f32.mrf.mxu0  ;;  %v2005_v7 = vpop.f32.mrf.mxu1 }
  0xeb   : > { %721 = vmatprep.mubr.f32.mxu0 %v558_v3  ;;  %826 = vmatprep.mubr.f32.mxu1 %v560_v4  ;;  %v563_v8 = vmul.f32 %v2005_v7, %v2005_v7  ;;  %v561_v13 = vmul.f32 %v2003_v6, %v2003_v6 }
  0xec   : > { %v2009_v9 = vpop.f32.mrf.mxu0  ;;  %v2011_v10 = vpop.f32.mrf.mxu1  ;;  %722 = vmatmul.mubr.f32.gmra.mxu0 %v557_v5  ;;  %827 = vmatmul.mubr.f32.gmra.mxu1 %v559_v0 }
  0xed   : > { %v562_v11 = vmul.f32 %v2009_v9, %v2009_v9  ;;  %v564_v12 = vmul.f32 %v2011_v10, %v2011_v10 }
  0xee   : > { %v2019_v14 = vpop.f32.mrf.mxu0  ;;  %v2021_v15 = vpop.f32.mrf.mxu1 }
  0xef   : > { %726 = vmatprep.mubr.f32.mxu0 %v562_v11  ;;  %831 = vmatprep.mubr.f32.mxu1 %v564_v12  ;;  %v567_v16 = vmul.f32 %v2021_v15, %v2021_v15  ;;  %v565_v22 = vmul.f32 %v2019_v14, %v2019_v14 }
  0xf0   : > { %v2025_v18 = vpop.f32.mrf.mxu0  ;;  %v2027_v19 = vpop.f32.mrf.mxu1  ;;  %727 = vmatmul.mubr.f32.gmra.mxu0 %v561_v13  ;;  %832 = vmatmul.mubr.f32.gmra.mxu1 %v563_v8 }
  0xf1   : > { %v566_v20 = vmul.f32 %v2025_v18, %v2025_v18  ;;  %v568_v21 = vmul.f32 %v2027_v19, %v2027_v19 }
  0xf2   : > { %v2035_v23 = vpop.f32.mrf.mxu0  ;;  %v2037_v24 = vpop.f32.mrf.mxu1 }
  0xf3   : > { %731 = vmatprep.mubr.f32.mxu0 %v566_v20  ;;  %836 = vmatprep.mubr.f32.mxu1 %v568_v21  ;;  %v571_v25 = vmul.f32 %v2037_v24, %v2037_v24  ;;  %v569_v34 = vmul.f32 %v2035_v23, %v2035_v23 }
  0xf4   : > { %v2041_v26 = vpop.f32.mrf.mxu0  ;;  %v2043_v27 = vpop.f32.mrf.mxu1  ;;  %732 = vmatmul.mubr.f32.gmra.mxu0 %v565_v22  ;;  %837 = vmatmul.mubr.f32.gmra.mxu1 %v567_v16 }
  0xf5   : > { %v570_v30 = vmul.f32 %v2041_v26, %v2041_v26  ;;  %v572_v33 = vmul.f32 %v2043_v27, %v2043_v27 }
  0xf7   : > { %736 = vmatprep.mubr.f32.mxu0 %v570_v30  ;;  %841 = vmatprep.mubr.f32.mxu1 %v572_v33 }
  0xf8   : > { %737 = vmatmul.mubr.f32.gmra.mxu0 %v569_v34  ;;  %842 = vmatmul.mubr.f32.gmra.mxu1 %v571_v25 }
  0xf9   : > { %952 = vmatprep.mubr.f32.mxu0 %v1574_v17  ;;  %1065 = vmatprep.mubr.f32.mxu1 %v1574_v17 }
 0x19c   : > { %v1429_v43 = vpop.f32.mrf.mxu0  ;;  %v1485_v44 = vpop.f32.mrf.mxu1 }
 0x19e   : > { %v1430_v45 = vpop.f32.mrf.mxu0  ;;  %v1486_v48 = vpop.f32.mrf.mxu1 }
 0x19f   : > { %v1431_v51 = vadd.f32 %v1430_v45, %v1429_v43  ;;  %v1487_v59 = vadd.f32 %v1486_v48, %v1485_v44 }
 0x1a0   : > { %v1432_v52 = vpop.f32.mrf.mxu0  ;;  %v1488_v53 = vpop.f32.mrf.mxu1 }
 0x1a1   : > { %v704_v56 = vadd.f32 1e-05, %v1431_v51 }
 0x1a2   : > { %v1433_v60 = vpop.f32.mrf.mxu0  ;;  %v1489_v61 = vpop.f32.mrf.mxu1 }
 0x1a3   : > { %v809_v0 = vadd.f32 %v1487_v59, %v704_v56  ;;  %v1434_v3 = vadd.f32 %v1433_v60, %v1432_v52  ;;  %v1490_v11 = vadd.f32 %v1489_v61, %v1488_v53 }
 0x1a4   : > { %v1435_v4 = vpop.f32.mrf.mxu0  ;;  %v1491_v5 = vpop.f32.mrf.mxu1 }
 0x1a5   : > { %1534 = vrsqrt.f32 %v809_v0  ;;  %v709_v8 = vadd.f32 1e-05, %v1434_v3 }
 0x1a6   : > { %v1436_v12 = vpop.f32.mrf.mxu0  ;;  %v1492_v13 = vpop.f32.mrf.mxu1 }
 0x1a7   : > { %v814_v16 = vadd.f32 %v1490_v11, %v709_v8  ;;  %v1437_v20 = vadd.f32 %v1436_v12, %v1435_v4  ;;  %v1493_v30 = vadd.f32 %v1492_v13, %v1491_v5 }
 0x1a8   : > { %v1438_v21 = vpop.f32.mrf.mxu0  ;;  %v1494_v22 = vpop.f32.mrf.mxu1 }
 0x1a9   : > { %1536 = vrsqrt.f32 %v814_v16  ;;  %v714_v25 = vadd.f32 1e-05, %v1437_v20 }
 0x1aa   : > { %v1439_v33 = vpop.f32.mrf.mxu0  ;;  %v1495_v34 = vpop.f32.mrf.mxu1 }
 0x1ab   : > { %v819_v35 = vadd.f32 %v1493_v30, %v714_v25  ;;  %v1440_v38 = vadd.f32 %v1439_v33, %v1438_v21  ;;  %v1496_v44 = vadd.f32 %v1495_v34, %v1494_v22 }
 0x1ac   : > { %v1441_v39 = vpop.f32.mrf.mxu0  ;;  %v1497_v40 = vpop.f32.mrf.mxu1 }
 0x1ad   : > { %1538 = vrsqrt.f32 %v819_v35  ;;  %v719_v43 = vadd.f32 1e-05, %v1440_v38 }
 0x1ae   : > { %v1442_v45 = vpop.f32.mrf.mxu0  ;;  %v1498_v48 = vpop.f32.mrf.mxu1 }
 0x1af   : > { %v824_v51 = vadd.f32 %v1496_v44, %v719_v43  ;;  %v1443_v52 = vadd.f32 %v1442_v45, %v1441_v39  ;;  %v1499_v60 = vadd.f32 %v1498_v48, %v1497_v40 }
 0x1b0   : > { %v1444_v53 = vpop.f32.mrf.mxu0  ;;  %v1500_v56 = vpop.f32.mrf.mxu1 }
 0x1b1   : > { %1540 = vrsqrt.f32 %v824_v51  ;;  %v724_v59 = vadd.f32 1e-05, %v1443_v52 }
 0x1b2   : > { %v1535_v61 = vpop.eup %1534  ;;  %v1445_v0 = vpop.f32.mrf.mxu0 }
 0x1b3   : > { %v1501_v3 = vpop.f32.mrf.mxu1  ;;  %v829_v4 = vadd.f32 %v1499_v60, %v724_v59  ;;  %v1446_v5 = vadd.f32 %v1445_v0, %v1444_v53  ;;  %1353 = vmatmul.mubr.msk.f32.vlgmr.msra.gmra.mxu0 %vm863_vm1, %v1535_v61  ;;  %1361 = vmatmul.mubr.msk.f32.vlgmr.msra.gmra.mxu1 %vm863_vm1, %v1535_v61  ;;  %v1148_v61 = vlaneseq }
 0x1b4   : > { %v1447_v8 = vpop.f32.mrf.mxu0  ;;  %958 = vmatprep.mubr.f32.mxu0 %v1574_v17  ;;  %1071 = vmatprep.mubr.f32.mxu1 %v1574_v17  ;;  %v1502_v13 = vadd.f32 %v1501_v3, %v1500_v56 }
 0x1b5   : > { %v1503_v11 = vpop.f32.mrf.mxu1  ;;  %1542 = vrsqrt.f32 %v829_v4  ;;  %v729_v12 = vadd.f32 1e-05, %v1446_v5  ;;  %v1149_v0 = vshrl.u32 %v1148_v61, 7  ;;  %v1146_v5 = vld [vmem:[%s2221_s4] sm:$0xf] }
 0x1b6   : > { %v1537_v16 = vpop.eup %1536  ;;  %v1448_v20 = vpop.f32.mrf.mxu0 }
 0x1b7   : > { %v1504_v21 = vpop.f32.mrf.mxu1  ;;  %v834_v22 = vadd.f32 %v1502_v13, %v729_v12  ;;  %v1449_v25 = vadd.f32 %v1448_v20, %v1447_v8  ;;  %1354 = vmatmul.mubr.msk.f32.gmra.mxu0 %vm863_vm1, %v1537_v16  ;;  %1362 = vmatmul.mubr.msk.f32.gmra.mxu1 %vm863_vm1, %v1537_v16  ;;  %v1150_v3 = vsub.s32 0, %v1149_v0  ;;  %v1158_v4 = vsub.s32 2, %v1149_v0 }
 0x1b8   : > { %v1450_v30 = vpop.f32.mrf.mxu0  ;;  %964 = vmatprep.mubr.f32.mxu0 %v1574_v17  ;;  %1077 = vmatprep.mubr.f32.mxu1 %v1574_v17  ;;  %v1505_v35 = vadd.f32 %v1504_v21, %v1503_v11  ;;  %v1154_v8 = vsub.s32 1, %v1149_v0  ;;  %v1162_v11 = vsub.s32 3, %v1149_v0 }
 0x1b9   : > { %v1506_v33 = vpop.f32.mrf.mxu1  ;;  %1544 = vrsqrt.f32 %v834_v22  ;;  %v734_v34 = vadd.f32 1e-05, %v1449_v25  ;;  %v2099_v12 = vrot.slane %v1146_v5, %v1150_v3  ;;  %v2101_v13 = vrot.slane %v1146_v5, %v1158_v4 }
 0x1ba   : > { %v1539_v38 = vpop.eup %1538  ;;  %v1451_v39 = vpop.f32.mrf.mxu0  ;;  %v2105_v22 = vrot.slane %v1146_v5, %v1154_v8  ;;  %v2107_v25 = vrot.slane %v1146_v5, %v1162_v11 }
 0x1bb   : > { %v1507_v40 = vpop.f32.mrf.mxu1  ;;  %v839_v43 = vadd.f32 %v1505_v35, %v734_v34  ;;  %v1452_v44 = vadd.f32 %v1451_v39, %v1450_v30  ;;  %1355 = vmatmul.mubr.msk.f32.gmra.mxu0 %vm863_vm1, %v1539_v38  ;;  %1363 = vmatmul.mubr.msk.f32.gmra.mxu1 %vm863_vm1, %v1539_v38 }
 0x1bc   : > { %970 = vmatprep.mubr.f32.mxu0 %v1574_v17  ;;  %1083 = vmatprep.mubr.f32.mxu1 %v1574_v17  ;;  %v1508_v48 = vadd.f32 %v1507_v40, %v1506_v33 }
 0x1bd   : > { %1546 = vrsqrt.f32 %v839_v43  ;;  %v739_v45 = vadd.f32 1e-05, %v1452_v44 }
 0x1be   : > { %v1541_v51 = vpop.eup %1540 }
 0x1bf   : > { %v844_v52 = vadd.f32 %v1508_v48, %v739_v45  ;;  %1356 = vmatmul.mubr.msk.f32.gmra.mxu0 %vm863_vm1, %v1541_v51  ;;  %1364 = vmatmul.mubr.msk.f32.gmra.mxu1 %vm863_vm1, %v1541_v51 }
 0x1c0   : > { %976 = vmatprep.mubr.f32.mxu0 %v1574_v17  ;;  %1089 = vmatprep.mubr.f32.mxu1 %v1574_v17 }
 0x1c1   : > { %1548 = vrsqrt.f32 %v844_v52 }
 0x1c2   : > { %v1543_v53 = vpop.eup %1542 }
 0x1c3   : > { %1357 = vmatmul.mubr.msk.f32.gmra.mxu0 %vm863_vm1, %v1543_v53  ;;  %1365 = vmatmul.mubr.msk.f32.gmra.mxu1 %vm863_vm1, %v1543_v53 }
 0x1c4   : > { %982 = vmatprep.mubr.f32.mxu0 %v1574_v17  ;;  %1095 = vmatprep.mubr.f32.mxu1 %v1574_v17 }
 0x1c6   : > { %v1545_v56 = vpop.eup %1544 }
 0x1c7   : > { %1358 = vmatmul.mubr.msk.f32.gmra.mxu0 %vm863_vm1, %v1545_v56  ;;  %1366 = vmatmul.mubr.msk.f32.gmra.mxu1 %vm863_vm1, %v1545_v56 }
 0x1c8   : > { %988 = vmatprep.mubr.f32.mxu0 %v1574_v17  ;;  %1101 = vmatprep.mubr.f32.mxu1 %v1574_v17 }
 0x1ca   : > { %v1547_v59 = vpop.eup %1546 }
 0x1cb   : > { %1359 = vmatmul.mubr.msk.f32.gmra.mxu0 %vm863_vm1, %v1547_v59  ;;  %1367 = vmatmul.mubr.msk.f32.gmra.mxu1 %vm863_vm1, %v1547_v59 }
 0x1cc   : > { %994 = vmatprep.mubr.f32.mxu0 %v1574_v17  ;;  %1107 = vmatprep.mubr.f32.mxu1 %v1574_v17 }
 0x1ce   : > { %v1549_v60 = vpop.eup %1548 }
 0x1cf   : > { %1360 = vmatmul.mubr.msk.f32.gmra.mxu0 %vm863_vm1, %v1549_v60  ;;  %1368 = vmatmul.mubr.msk.f32.gmra.mxu1 %vm863_vm1, %v1549_v60 }
 0x273   : > { %v954_v17 = vpop.f32.mrf.mxu0  ;;  %v1067_v16 = vpop.f32.mrf.mxu1 }
 0x274   : > { %v1114_v20 = vmul.f32 %v954_v17, %v1917_v28  ;;  %v1116_v21 = vmul.f32 %v1067_v16, %v1919_v29 }
 0x275   : > { %v956_v30 = vpop.f32.mrf.mxu0  ;;  %v1069_v33 = vpop.f32.mrf.mxu1 }
 0x276   : > { %v1168_v34 = vadd.f32 %v2099_v12, %v1114_v20  ;;  %v1170_v28 = vadd.f32 %v2101_v13, %v1116_v21  ;;  %v1115_v29 = vmul.f32 %v956_v30, %v1923_v31  ;;  %v1117_v35 = vmul.f32 %v1069_v33, %v1925_v32 }
 0x277   : > { %v960_v38 = vpop.f32.mrf.mxu0  ;;  %v1073_v39 = vpop.f32.mrf.mxu1 }
 0x278   : > { %1200 = vst [vmem:[%s2112_s16] sm:$0xff] %v1168_v34  ;;  %1377 = vst [vmem:[%s2112_s16 + $0x10] sm:$0xff] %v1170_v28  ;;  %v1169_v40 = vadd.f32 %v2105_v22, %v1115_v29  ;;  %v1171_v43 = vadd.f32 %v2107_v25, %v1117_v35  ;;  %v1118_v44 = vmul.f32 %v960_v38, %v1933_v36 }
 0x279   : > { %v1120_v45 = vmul.f32 %v1073_v39, %v1935_v37  ;;  %v962_v48 = vpop.f32.mrf.mxu0  ;;  %v1075_v51 = vpop.f32.mrf.mxu1 }
 0x27a   : > { %1369 = vst [vmem:[%s2112_s16 + $0x8] sm:$0xff] %v1169_v40  ;;  %1385 = vst [vmem:[%s2112_s16 + $0x18] sm:$0xff] %v1171_v43  ;;  %v1172_v31 = vadd.f32 %v2099_v12, %v1118_v44  ;;  %v1119_v52 = vmul.f32 %v962_v48, %v1945_v41  ;;  %v1121_v53 = vmul.f32 %v1075_v51, %v1947_v42 }
 0x27b   : > { %v1174_v32 = vadd.f32 %v2101_v13, %v1120_v45  ;;  %v966_v56 = vpop.f32.mrf.mxu0  ;;  %v1079_v59 = vpop.f32.mrf.mxu1 }
 0x27c   : > { %1201 = vst [vmem:[%s2112_s16 + $0x20] sm:$0xff] %v1172_v31  ;;  %v1173_v36 = vadd.f32 %v2105_v22, %v1119_v52  ;;  %v1175_v37 = vadd.f32 %v2107_v25, %v1121_v53  ;;  %v1122_v60 = vmul.f32 %v966_v56, %v1955_v46  ;;  %v1124_v61 = vmul.f32 %v1079_v59, %v1957_v47 }
 0x27d   : > { %1378 = vst [vmem:[%s2112_s16 + $0x30] sm:$0xff] %v1174_v32  ;;  %v968_v0 = vpop.f32.mrf.mxu0  ;;  %v1081_v3 = vpop.f32.mrf.mxu1 }
 0x27e   : > { %1370 = vst [vmem:[%s2112_s16 + $0x28] sm:$0xff] %v1173_v36  ;;  %1386 = vst [vmem:[%s2112_s16 + $0x38] sm:$0xff] %v1175_v37  ;;  %v1176_v41 = vadd.f32 %v2099_v12, %v1122_v60  ;;  %v1178_v42 = vadd.f32 %v2101_v13, %v1124_v61  ;;  %v1123_v4 = vmul.f32 %v968_v0, %v1961_v49 }
 0x27f   : > { %v1125_v5 = vmul.f32 %v1081_v3, %v1963_v50  ;;  %v972_v8 = vpop.f32.mrf.mxu0  ;;  %v1085_v11 = vpop.f32.mrf.mxu1 }
 0x280   : > { %1202 = vst [vmem:[%s2112_s16 + $0x40] sm:$0xff] %v1176_v41  ;;  %1379 = vst [vmem:[%s2112_s16 + $0x50] sm:$0xff] %v1178_v42  ;;  %v1177_v46 = vadd.f32 %v2105_v22, %v1123_v4  ;;  %v1126_v17 = vmul.f32 %v972_v8, %v1971_v54  ;;  %v1128_v16 = vmul.f32 %v1085_v11, %v1973_v55 }
 0x281   : > { %v1179_v47 = vadd.f32 %v2107_v25, %v1125_v5  ;;  %v974_v20 = vpop.f32.mrf.mxu0  ;;  %v1087_v21 = vpop.f32.mrf.mxu1 }
 0x282   : > { %1371 = vst [vmem:[%s2112_s16 + $0x48] sm:$0xff] %v1177_v46  ;;  %v1180_v49 = vadd.f32 %v2099_v12, %v1126_v17  ;;  %v1182_v50 = vadd.f32 %v2101_v13, %v1128_v16  ;;  %v1127_v30 = vmul.f32 %v974_v20, %v1977_v57  ;;  %v1129_v33 = vmul.f32 %v1087_v21, %v1979_v58 }
 0x283   : > { %1387 = vst [vmem:[%s2112_s16 + $0x58] sm:$0xff] %v1179_v47  ;;  %v978_v34 = vpop.f32.mrf.mxu0  ;;  %v1091_v28 = vpop.f32.mrf.mxu1 }
 0x284   : > { %1203 = vst [vmem:[%s2112_s16 + $0x60] sm:$0xff] %v1180_v49  ;;  %1380 = vst [vmem:[%s2112_s16 + $0x70] sm:$0xff] %v1182_v50  ;;  %v1181_v54 = vadd.f32 %v2105_v22, %v1127_v30  ;;  %v1183_v55 = vadd.f32 %v2107_v25, %v1129_v33  ;;  %v1130_v29 = vmul.f32 %v978_v34, %v1987_v62 }
 0x285   : > { %v1132_v35 = vmul.f32 %v1091_v28, %v1989_v63  ;;  %v980_v38 = vpop.f32.mrf.mxu0  ;;  %v1093_v39 = vpop.f32.mrf.mxu1 }
 0x286   : > { %1372 = vst [vmem:[%s2112_s16 + $0x68] sm:$0xff] %v1181_v54  ;;  %1388 = vst [vmem:[%s2112_s16 + $0x78] sm:$0xff] %v1183_v55  ;;  %v1184_v57 = vadd.f32 %v2099_v12, %v1130_v29  ;;  %v1131_v40 = vmul.f32 %v980_v38, %v1993_v1  ;;  %v1133_v43 = vmul.f32 %v1093_v39, %v1995_v2 }
 0x287   : > { %v1186_v58 = vadd.f32 %v2101_v13, %v1132_v35  ;;  %v984_v44 = vpop.f32.mrf.mxu0  ;;  %v1097_v45 = vpop.f32.mrf.mxu1 }
 0x288   : > { %1204 = vst [vmem:[%s2112_s16 + $0x80] sm:$0xff] %v1184_v57  ;;  %v1185_v62 = vadd.f32 %v2105_v22, %v1131_v40  ;;  %v1187_v63 = vadd.f32 %v2107_v25, %v1133_v43  ;;  %v1134_v48 = vmul.f32 %v984_v44, %v2003_v6  ;;  %v1136_v51 = vmul.f32 %v1097_v45, %v2005_v7 }
 0x289   : > { %1381 = vst [vmem:[%s2112_s16 + $0x90] sm:$0xff] %v1186_v58  ;;  %v986_v31 = vpop.f32.mrf.mxu0  ;;  %v1099_v32 = vpop.f32.mrf.mxu1 }
 0x28a   : > { %1373 = vst [vmem:[%s2112_s16 + $0x88] sm:$0xff] %v1185_v62  ;;  %1389 = vst [vmem:[%s2112_s16 + $0x98] sm:$0xff] %v1187_v63  ;;  %v1188_v1 = vadd.f32 %v2099_v12, %v1134_v48  ;;  %v1190_v2 = vadd.f32 %v2101_v13, %v1136_v51  ;;  %v1135_v52 = vmul.f32 %v986_v31, %v2009_v9 }
 0x28b   : > { %v1137_v53 = vmul.f32 %v1099_v32, %v2011_v10  ;;  %v990_v56 = vpop.f32.mrf.mxu0  ;;  %v1103_v59 = vpop.f32.mrf.mxu1 }
 0x28c   : > { %1205 = vst [vmem:[%s2112_s16 + $0xa0] sm:$0xff] %v1188_v1  ;;  %1382 = vst [vmem:[%s2112_s16 + $0xb0] sm:$0xff] %v1190_v2  ;;  %v1189_v6 = vadd.f32 %v2105_v22, %v1135_v52  ;;  %v1138_v36 = vmul.f32 %v990_v56, %v2019_v14  ;;  %v1140_v37 = vmul.f32 %v1103_v59, %v2021_v15 }
 0x28d   : > { %v1191_v7 = vadd.f32 %v2107_v25, %v1137_v53  ;;  %v992_v60 = vpop.f32.mrf.mxu0  ;;  %v1105_v61 = vpop.f32.mrf.mxu1 }
 0x28e   : > { %1374 = vst [vmem:[%s2112_s16 + $0xa8] sm:$0xff] %v1189_v6  ;;  %v1192_v9 = vadd.f32 %v2099_v12, %v1138_v36  ;;  %v1194_v10 = vadd.f32 %v2101_v13, %v1140_v37  ;;  %v1139_v0 = vmul.f32 %v992_v60, %v2025_v18  ;;  %v1141_v3 = vmul.f32 %v1105_v61, %v2027_v19 }
 0x28f   : > { %1390 = vst [vmem:[%s2112_s16 + $0xb8] sm:$0xff] %v1191_v7  ;;  %v996_v41 = vpop.f32.mrf.mxu0  ;;  %v1109_v42 = vpop.f32.mrf.mxu1 }
 0x290   : > { %1206 = vst [vmem:[%s2112_s16 + $0xc0] sm:$0xff] %v1192_v9  ;;  %1383 = vst [vmem:[%s2112_s16 + $0xd0] sm:$0xff] %v1194_v10  ;;  %v1193_v14 = vadd.f32 %v2105_v22, %v1139_v0  ;;  %v1195_v15 = vadd.f32 %v2107_v25, %v1141_v3  ;;  %v1142_v4 = vmul.f32 %v996_v41, %v2035_v23 }
 0x291   : > { %v1144_v5 = vmul.f32 %v1109_v42, %v2037_v24  ;;  %v998_v8 = vpop.f32.mrf.mxu0  ;;  %v1111_v18 = vpop.f32.mrf.mxu1 }
 0x292   : > { %1375 = vst [vmem:[%s2112_s16 + $0xc8] sm:$0xff] %v1193_v14  ;;  %1391 = vst [vmem:[%s2112_s16 + $0xd8] sm:$0xff] %v1195_v15  ;;  %v1196_v19 = vadd.f32 %v2099_v12, %v1142_v4  ;;  %v1143_v46 = vmul.f32 %v998_v8, %v2041_v26  ;;  %v1145_v47 = vmul.f32 %v1111_v18, %v2043_v27 }
 0x293   : > { %v1198_v11 = vadd.f32 %v2101_v13, %v1144_v5 }
 0x294   : > { %1207 = vst [vmem:[%s2112_s16 + $0xe0] sm:$0xff] %v1196_v19  ;;  %v1197_v17 = vadd.f32 %v2105_v22, %v1143_v46  ;;  %v1199_v23 = vadd.f32 %v2107_v25, %v1145_v47 }
 0x295   : > { %1384 = vst [vmem:[%s2112_s16 + $0xf0] sm:$0xff] %v1198_v11 }
 0x296   : > { %1376 = vst [vmem:[%s2112_s16 + $0xe8] sm:$0xff] %v1197_v17  ;;  %1392 = vst [vmem:[%s2112_s16 + $0xf8] sm:$0xff] %v1199_v23 }
 0x297 PF: > { %s15_s20 = sadd.s32 1, %s1572_s20   ;;  %s2223_s18 = smov %s1568_s19 }
 0x298   : > { %p12_p5 = scmp.ge.s32.totalorder %s15_s20, 4   ;;  %s2224_s19 = smov %s2226_s21 }
 0x29a   :  { %14 = sbr.rel (!%p12_p5) target bundleno = 2 (0x2), region = 73 }

</bundles_post_ra>
